<compile_context>
chip_gen: v5e
topology: v5e:2x2
jax: 0.10.0
libtpu: 0.0.40
codegen_flags: <defaults>
</compile_context>

<pallas_src>
from functools import partial

import jax
import jax.numpy as jnp
from jax import lax
from jax.experimental import pallas as pl
from jax.experimental.pallas import tpu as pltpu


ATOM_VOCABS = (119, 4)   # AtomEncoder: 2 categorical features
BOND_VOCABS = (5, 6)     # BondEncoder: 2 categorical features (per GIN layer)
BN_EPS = 1e-5


# ---------------------------------------------------------------------------
# Fused kernel: all L GIN layers, grid=(L,), h carried in the resident output.
#   msg_e  = relu(h[src[e]] + bond_emb[e])          (GINConv.message, f32)
#   aggr   = scatter_add(dst, msg)                  (index based, VMEM scratch)
#   z      = (1 + eps) * h + aggr
#   z1     = relu(z @ W1' + b1')                    (GIN MLP, BN1 folded, bf16 MXU)
#   z2     = z1 @ W2' + b2'                         (outer BatchNorm folded)
#   h'     = relu(z2) on all but the last layer     (eval dropout == identity)
# ---------------------------------------------------------------------------
def _fused_gin_kernel(eps1_ref, src_ref, dst_ref, h0_hbm_ref,
                      eemb_ref, w1_ref, b1_ref, w2_ref, b2_ref,
                      out_ref, aggr_ref, seed_sem):
    l = pl.program_id(0)
    last = pl.num_programs(0) - 1
    num_edges = eemb_ref.shape[0]

    # Layer 0: seed the VMEM-resident node state straight from the (aliased)
    # HBM buffer -- no VMEM input block / no double-buffering for h0.
    @pl.when(l == 0)
    def _seed():
        cp = pltpu.make_async_copy(h0_hbm_ref, out_ref, seed_sem)
        cp.start()
        cp.wait()

    # ---- GINConv message passing, index based (O(E*D) work, pure f32) ------
    aggr_ref[...] = jnp.zeros_like(aggr_ref)

    def edge_body(e, carry):
        s = src_ref[e]                                   # SMEM scalar reads
        d = dst_ref[e]
        msg = jnp.maximum(
            out_ref[pl.ds(s, 1), :] + eemb_ref[pl.ds(e, 1), :], 0.0)   # (1, D)
        aggr_ref[pl.ds(d, 1), :] = aggr_ref[pl.ds(d, 1), :] + msg      # scatter-add
        return carry

    lax.fori_loop(0, num_edges, edge_body, 0)

    h = out_ref[...]                               # (N, D) f32, previous layer
    z = eps1_ref[l] * h + aggr_ref[...]            # (1 + eps) * h + aggr

    # ---- GIN internal MLP; BatchNorms folded into (W, b); bf16 MXU, f32 acc -
    z1 = jnp.dot(z.astype(jnp.bfloat16), w1_ref[...],
                 preferred_element_type=jnp.float32) + b1_ref[...]
    z1 = jnp.maximum(z1, 0.0)
    z2 = jnp.dot(z1.astype(jnp.bfloat16), w2_ref[...],
                 preferred_element_type=jnp.float32) + b2_ref[...]

    # ReLU on every layer except the last (last layer: dropout only -> identity).
    @pl.when(l != last)
    def _store_hidden():
        out_ref[...] = jnp.maximum(z2, 0.0)

    @pl.when(l == last)
    def _store_last():
        out_ref[...] = z2


def fused_gin_forward(h0, src, dst, eps1, eemb_all, w1_all, b1_all, w2_all, b2_all):
    L, _, D2 = w1_all.shape
    N, D = h0.shape
    E = src.shape[0]

    resident = lambda l: (0, 0)        # same block each layer -> stays in VMEM
    per_layer = lambda l: (l, 0, 0)    # stream layer l's slab

    return pl.pallas_call(
        _fused_gin_kernel,
        out_shape=jax.ShapeDtypeStruct((N, D), jnp.float32),
        grid=(L,),
        in_specs=[
            pl.BlockSpec(memory_space=pltpu.MemorySpace.SMEM),   # eps1 (L,)  f32
            pl.BlockSpec(memory_space=pltpu.MemorySpace.SMEM),   # src  (E,)  i32
            pl.BlockSpec(memory_space=pltpu.MemorySpace.SMEM),   # dst  (E,)  i32
            pl.BlockSpec(memory_space=pl.ANY),                   # h0 raw HBM (aliased)
            pl.BlockSpec((None, E, D), per_layer),               # bond emb   f32
            pl.BlockSpec((None, D, D2), per_layer),              # W1 (BN1 folded) bf16
            pl.BlockSpec((None, 1, D2), per_layer),              # b1 f32
            pl.BlockSpec((None, D2, D), per_layer),              # W2 (BN2 folded) bf16
            pl.BlockSpec((None, 1, D), per_layer),               # b2 f32
        ],
        out_specs=pl.BlockSpec((N, D), resident),                # h carrier / result
        scratch_shapes=[
            pltpu.VMEM((N, D), jnp.float32),                     # aggr accumulator
            pltpu.SemaphoreType.DMA,                             # h0 seed DMA sem
        ],
        input_output_aliases={3: 0},                             # h0 buffer -> output
        compiler_params=pltpu.CompilerParams(
            dimension_semantics=("arbitrary",),                  # layers sequential
            vmem_limit_bytes=48 * 1024 * 1024,                   # < v7x 64 MiB phys
        ),
    )(eps1, src, dst, h0, eemb_all, w1_all, b1_all, w2_all, b2_all)


# ---------------------------------------------------------------------------
# Parameter construction (deterministic, synthetic), BN folding on the host.
# ---------------------------------------------------------------------------
def make_params(key, num_layers, emb_dim):
    keys = iter(jax.random.split(key, 8 + 16 * num_layers))
    nrm = lambda shape, scale=0.1: scale * jax.random.normal(next(keys), shape, jnp.float32)

    params = {
        "w3d": nrm((3, emb_dim)),
        "b3d": nrm((1, emb_dim)),
        "atom_tables": [nrm((v, emb_dim)) for v in ATOM_VOCABS],
    }
    eps1_l, w1_l, b1_l, w2_l, b2_l, bond_l = [], [], [], [], [], []
    for _ in range(num_layers):
        w1 = nrm((emb_dim, 2 * emb_dim)); b1 = nrm((1, 2 * emb_dim))
        g1 = 1.0 + nrm((1, 2 * emb_dim)); be1 = nrm((1, 2 * emb_dim))
        w2 = nrm((2 * emb_dim, emb_dim)); b2 = nrm((1, emb_dim))
        g2 = 1.0 + nrm((1, emb_dim)); be2 = nrm((1, emb_dim))
        # Eval-mode BatchNorm folded into the preceding Linear:
        #   (x@w + b)*s + t == x@(w*s) + (b*s + t), s = gamma/sqrt(var+eps),
        #   t = beta - mean*s   (running_mean=0, running_var=1 at init; the
        #   formula generalizes to real checkpoint statistics).
        s1 = g1 / jnp.sqrt(1.0 + BN_EPS); t1 = be1
        s2 = g2 / jnp.sqrt(1.0 + BN_EPS); t2 = be2
        w1_l.append(w1 * s1); b1_l.append(b1 * s1 + t1)
        w2_l.append(w2 * s2); b2_l.append(b2 * s2 + t2)
        eps1_l.append(jnp.ones((), jnp.float32))   # GIN eps = 0  ->  1 + eps = 1
        bond_l.append([nrm((v, emb_dim)) for v in BOND_VOCABS])
    params["eps1"] = jnp.stack(eps1_l)             # (L,)  host-precomputed 1 + eps
    params["w1"] = jnp.stack(w1_l)                 # (L, D, 2D)  f32 master copy
    params["b1"] = jnp.stack(b1_l)                 # (L, 1, 2D)
    params["w2"] = jnp.stack(w2_l)                 # (L, 2D, D)
    params["b2"] = jnp.stack(b2_l)                 # (L, 1, D)
    params["bond_tables"] = bond_l
    return params


# ---------------------------------------------------------------------------
# Forward glue (embedding lookups + initial embedding in plain XLA).
# ---------------------------------------------------------------------------
@partial(jax.jit, static_argnames=("three_d",))
def gnn_shared_enc_forward(params, x_cat, xyz, edge_index, edge_attr, three_d=True):
    src = edge_index[0].astype(jnp.int32)
    dst = edge_index[1].astype(jnp.int32)

    # AtomEncoder + 3D linear -> initial node embedding h0 (plain XLA: a
    # (N,3)@(3,D) matmul + table lookups are not worth a kernel launch).
    atom_emb = sum(params["atom_tables"][f][x_cat[:, f]]
                   for f in range(x_cat.shape[1]))
    if three_d and xyz.shape[-1] == 3:
        h0 = xyz @ params["w3d"] + params["b3d"] + atom_emb
    else:
        h0 = atom_emb

    # Per-layer BondEncoder lookups, stacked to (L, E, D) f32 (message path is f32).
    eemb = jnp.stack([
        sum(bt[f][edge_attr[:, f]] for f in range(edge_attr.shape[1]))
        for bt in params["bond_tables"]
    ])

    return fused_gin_forward(
        h0.astype(jnp.float32), src, dst, params["eps1"], eemb,
        params["w1"].astype(jnp.bfloat16), params["b1"],
        params["w2"].astype(jnp.bfloat16), params["b2"])


# ---------------------------------------------------------------------------
# Pure-JAX reference (f32) for a correctness sanity check.
# ---------------------------------------------------------------------------
def _reference_forward(params, x_cat, xyz, edge_index, edge_attr, three_d=True):
    src, dst = edge_index[0], edge_index[1]
    atom_emb = sum(params["atom_tables"][f][x_cat[:, f]]
                   for f in range(x_cat.shape[1]))
    h = xyz @ params["w3d"] + params["b3d"] + atom_emb if three_d else atom_emb
    L = params["w1"].shape[0]
    for l in range(L):
        eemb = sum(params["bond_tables"][l][f][edge_attr[:, f]]
                   for f in range(edge_attr.shape[1]))
        msg = jax.nn.relu(h[src] + eemb)
        aggr = jnp.zeros_like(h).at[dst].add(msg)
        z = params["eps1"][l] * h + aggr
        z1 = jax.nn.relu(z @ params["w1"][l] + params["b1"][l])
        z2 = z1 @ params["w2"][l] + params["b2"][l]
        h = z2 if l == L - 1 else jax.nn.relu(z2)
    return h


if __name__ == "__main__":
    key = jax.random.PRNGKey(0)
    k_param, k_x0, k_x1, k_xyz, k_src, k_dst, k_ea0, k_ea1 = jax.random.split(key, 8)

    # Small, lane/sublane friendly demo sizes: emb_dim = 128 (full vreg lane
    # width); N = 128 also answers the review's "pad node count to >=128" item.
    N, E, D, L = 128, 256, 128, 3   # nodes, directed edges, emb_dim, num_layers

    params = make_params(k_param, num_layers=L, emb_dim=D)

    x_cat = jnp.stack(
        [jax.random.randint(k_x0, (N,), 0, ATOM_VOCABS[0]),
         jax.random.randint(k_x1, (N,), 0, ATOM_VOCABS[1])], axis=1).astype(jnp.int32)
    xyz = jax.random.normal(k_xyz, (N, 3), jnp.float32)
    edge_index = jnp.stack(
        [jax.random.randint(k_src, (E,), 0, N),
         jax.random.randint(k_dst, (E,), 0, N)], axis=0).astype(jnp.int32)
    edge_attr = jnp.stack(
        [jax.random.randint(k_ea0, (E,), 0, BOND_VOCABS[0]),
         jax.random.randint(k_ea1, (E,), 0, BOND_VOCABS[1])], axis=1).astype(jnp.int32)

    node_repr = gnn_shared_enc_forward(params, x_cat, xyz, edge_index, edge_attr,
                                       three_d=True)
    node_repr = jax.block_until_ready(node_repr)
    assert node_repr.shape == (N, D) and node_repr.dtype == jnp.float32

    ref = jax.block_until_ready(
        _reference_forward(params, x_cat, xyz, edge_index, edge_attr, three_d=True))
    max_err = float(jnp.max(jnp.abs(node_repr - ref)))
    scale = float(jnp.max(jnp.abs(ref))) + 1e-6
    # Message passing is now exact f32; only the GIN-MLP matmuls are bf16 with
    # f32 accumulation, so the bound is tighter than the previous all-bf16 kernel.
    assert max_err <= 3e-2 + 3e-2 * scale, f"max_err={max_err} scale={scale}"

    print("KERNEL_OK")
</pallas_src>

<mosaic_0001>
module attributes {stable_mosaic.version = 11 : i64} {
  func.func @_fused_gin_kernel(%arg0: i32, %arg1: memref<3xf32, #tpu.memory_space<smem>>, %arg2: memref<256xi32, #tpu.memory_space<smem>>, %arg3: memref<256xi32, #tpu.memory_space<smem>>, %arg4: memref<128x128xf32, #tpu.memory_space<any>>, %arg5: memref<1x256x128xf32, #tpu.memory_space<vmem>>, %arg6: memref<1x128x256xbf16, #tpu.memory_space<vmem>>, %arg7: memref<1x1x256xf32, #tpu.memory_space<vmem>>, %arg8: memref<1x256x128xbf16, #tpu.memory_space<vmem>>, %arg9: memref<1x1x128xf32, #tpu.memory_space<vmem>>, %arg10: memref<128x128xf32, #tpu.memory_space<vmem>>, %arg11: memref<128x128xf32, #tpu.memory_space<vmem>>, %arg12: memref<!tpu.dma_semaphore, #tpu.memory_space<semaphore_mem>>) attributes {dimension_semantics = [#tpu.dimension_semantics<arbitrary>], iteration_bounds = array<i64: 3>, scalar_prefetch = 0 : i64, scratch_operands = 2 : i64, tpu.core_type = #tpu.core_type<tc>, window_params = [{transform_indices = @transform_0, window_bounds = array<i64: 3>}, {transform_indices = @transform_1, window_bounds = array<i64: 256>}, {transform_indices = @transform_2, window_bounds = array<i64: 256>}, {}, {transform_indices = @transform_4, window_bounds = array<i64: 1, 256, 128>}, {transform_indices = @transform_5, window_bounds = array<i64: 1, 128, 256>}, {transform_indices = @transform_6, window_bounds = array<i64: 1, 1, 256>}, {transform_indices = @transform_7, window_bounds = array<i64: 1, 256, 128>}, {transform_indices = @transform_8, window_bounds = array<i64: 1, 1, 128>}, {pipeline_mode = #tpu.pipeline_mode<synchronous>, transform_indices = @transform_9, window_bounds = array<i64: 128, 128>}]} {
    %c0_i32 = arith.constant 0 : i32
    %0 = arith.cmpi eq, %arg0, %c0_i32 : i32
    %1 = arith.extui %0 : i1 to i32
    %c0_i32_0 = arith.constant 0 : i32
    %2 = arith.cmpi ne, %1, %c0_i32_0 : i32
    scf.if %2 {
      tpu.enqueue_dma source(%arg4 : memref<128x128xf32, #tpu.memory_space<any>>) target(%arg10 : memref<128x128xf32, #tpu.memory_space<vmem>>) target_semaphore(%arg12 : memref<!tpu.dma_semaphore, #tpu.memory_space<semaphore_mem>>)
      tpu.wait_dma2 semaphore(%arg12 : memref<!tpu.dma_semaphore, #tpu.memory_space<semaphore_mem>>) src(%arg4 : memref<128x128xf32, #tpu.memory_space<any>>) dst(%arg10 : memref<128x128xf32, #tpu.memory_space<vmem>>)
    } else {
    }
    %cst = arith.constant 0.000000e+00 : f32
    %3 = vector.broadcast %cst : f32 to vector<128x128xf32>
    %c0 = arith.constant 0 : index
    %c0_1 = arith.constant 0 : index
    %4 = vector.load %arg11[%c0, %c0_1] : memref<128x128xf32, #tpu.memory_space<vmem>>, vector<128x128xf32>
    tpu.vector_store %arg11[%c0, %c0_1], %3 {strides = array<i32>} : memref<128x128xf32, #tpu.memory_space<vmem>>, vector<128x128xf32>,
    %c0_i32_2 = arith.constant 0 : i32
    %c256_i32 = arith.constant 256 : i32
    %5 = arith.addi %c0_i32_2, %c256_i32 : i32
    %c1_i32 = arith.constant 1 : i32
    scf.for %arg13 = %c0_i32_2 to %5 step %c1_i32  : i32 {
      %37 = arith.index_cast %arg13 : i32 to index
      %38 = memref.load %arg2[%37] : memref<256xi32, #tpu.memory_space<smem>>
      %39 = arith.index_cast %arg13 : i32 to index
      %40 = memref.load %arg3[%39] : memref<256xi32, #tpu.memory_space<smem>>
      %41 = arith.index_cast %38 : i32 to index
      %c0_26 = arith.constant 0 : index
      %42 = vector.load %arg10[%41, %c0_26] : memref<128x128xf32, #tpu.memory_space<vmem>>, vector<1x128xf32>
      %c0_27 = arith.constant 0 : index
      %43 = arith.index_cast %arg13 : i32 to index
      %c0_28 = arith.constant 0 : index
      %44 = vector.load %arg5[%c0_27, %43, %c0_28] : memref<1x256x128xf32, #tpu.memory_space<vmem>>, vector<1x1x128xf32>
      %45 = vector.shape_cast %44 : vector<1x1x128xf32> to vector<1x128xf32>
      %46 = arith.addf %42, %45 : vector<1x128xf32>
      %cst_29 = arith.constant 0.000000e+00 : f32
      %47 = vector.broadcast %cst_29 : f32 to vector<1x128xf32>
      %48 = arith.maximumf %46, %47 : vector<1x128xf32>
      %49 = arith.index_cast %40 : i32 to index
      %c0_30 = arith.constant 0 : index
      %50 = vector.load %arg11[%49, %c0_30] : memref<128x128xf32, #tpu.memory_space<vmem>>, vector<1x128xf32>
      %51 = arith.addf %50, %48 : vector<1x128xf32>
      %52 = arith.index_cast %40 : i32 to index
      %c0_31 = arith.constant 0 : index
      %53 = vector.load %arg11[%52, %c0_31] : memref<128x128xf32, #tpu.memory_space<vmem>>, vector<1x128xf32>
      tpu.vector_store %arg11[%52, %c0_31], %51 {strides = array<i32>} : memref<128x128xf32, #tpu.memory_space<vmem>>, vector<1x128xf32>,
    }
    %c256_i32_3 = arith.constant 256 : i32
    %c0_4 = arith.constant 0 : index
    %c0_5 = arith.constant 0 : index
    %6 = vector.load %arg10[%c0_4, %c0_5] : memref<128x128xf32, #tpu.memory_space<vmem>>, vector<128x128xf32>
    %7 = arith.index_cast %arg0 : i32 to index
    %8 = memref.load %arg1[%7] : memref<3xf32, #tpu.memory_space<smem>>
    %9 = vector.broadcast %8 : f32 to vector<128x128xf32>
    %10 = arith.mulf %9, %6 : vector<128x128xf32>
    %c0_6 = arith.constant 0 : index
    %c0_7 = arith.constant 0 : index
    %11 = vector.load %arg11[%c0_6, %c0_7] : memref<128x128xf32, #tpu.memory_space<vmem>>, vector<128x128xf32>
    %12 = arith.addf %10, %11 : vector<128x128xf32>
    %13 = arith.truncf %12 : vector<128x128xf32> to vector<128x128xbf16>
    %c0_8 = arith.constant 0 : index
    %c0_9 = arith.constant 0 : index
    %c0_10 = arith.constant 0 : index
    %14 = vector.load %arg6[%c0_8, %c0_9, %c0_10] : memref<1x128x256xbf16, #tpu.memory_space<vmem>>, vector<1x128x256xbf16>
    %15 = vector.shape_cast %14 : vector<1x128x256xbf16> to vector<128x256xbf16>
    %cst_11 = arith.constant dense<0.000000e+00> : vector<128x256xf32>
    %16 = tpu.matmul %13, %15, %cst_11 {dimension_numbers = #tpu.dot_dimension_numbers<[1], [0], [0], [1], [0, 0, 1, 1], [], []>} : vector<128x128xbf16>, vector<128x256xbf16>, vector<128x256xf32> -> vector<128x256xf32>
    %c0_12 = arith.constant 0 : index
    %c0_13 = arith.constant 0 : index
    %c0_14 = arith.constant 0 : index
    %17 = vector.load %arg7[%c0_12, %c0_13, %c0_14] : memref<1x1x256xf32, #tpu.memory_space<vmem>>, vector<1x1x256xf32>
    %18 = vector.shape_cast %17 : vector<1x1x256xf32> to vector<1x256xf32>
    %19 = vector.broadcast %18 : vector<1x256xf32> to vector<128x256xf32>
    %20 = arith.addf %16, %19 : vector<128x256xf32>
    %cst_15 = arith.constant 0.000000e+00 : f32
    %21 = vector.broadcast %cst_15 : f32 to vector<128x256xf32>
    %22 = arith.maximumf %20, %21 : vector<128x256xf32>
    %23 = arith.truncf %22 : vector<128x256xf32> to vector<128x256xbf16>
    %c0_16 = arith.constant 0 : index
    %c0_17 = arith.constant 0 : index
    %c0_18 = arith.constant 0 : index
    %24 = vector.load %arg8[%c0_16, %c0_17, %c0_18] : memref<1x256x128xbf16, #tpu.memory_space<vmem>>, vector<1x256x128xbf16>
    %25 = vector.shape_cast %24 : vector<1x256x128xbf16> to vector<256x128xbf16>
    %cst_19 = arith.constant dense<0.000000e+00> : vector<128x128xf32>
    %26 = tpu.matmul %23, %25, %cst_19 {dimension_numbers = #tpu.dot_dimension_numbers<[1], [0], [0], [1], [0, 0, 1, 1], [], []>} : vector<128x256xbf16>, vector<256x128xbf16>, vector<128x128xf32> -> vector<128x128xf32>
    %c0_20 = arith.constant 0 : index
    %c0_21 = arith.constant 0 : index
    %c0_22 = arith.constant 0 : index
    %27 = vector.load %arg9[%c0_20, %c0_21, %c0_22] : memref<1x1x128xf32, #tpu.memory_space<vmem>>, vector<1x1x128xf32>
    %28 = vector.shape_cast %27 : vector<1x1x128xf32> to vector<1x128xf32>
    %29 = vector.broadcast %28 : vector<1x128xf32> to vector<128x128xf32>
    %30 = arith.addf %26, %29 : vector<128x128xf32>
    %c2_i32 = arith.constant 2 : i32
    %31 = arith.cmpi ne, %arg0, %c2_i32 : i32
    %32 = arith.extui %31 : i1 to i32
    %c0_i32_23 = arith.constant 0 : i32
    %33 = arith.cmpi ne, %32, %c0_i32_23 : i32
    scf.if %33 {
      %cst_26 = arith.constant 0.000000e+00 : f32
      %37 = vector.broadcast %cst_26 : f32 to vector<128x128xf32>
      %38 = arith.maximumf %30, %37 : vector<128x128xf32>
      %c0_27 = arith.constant 0 : index
      %c0_28 = arith.constant 0 : index
      %39 = vector.load %arg10[%c0_27, %c0_28] : memref<128x128xf32, #tpu.memory_space<vmem>>, vector<128x128xf32>
      tpu.vector_store %arg10[%c0_27, %c0_28], %38 {strides = array<i32>} : memref<128x128xf32, #tpu.memory_space<vmem>>, vector<128x128xf32>,
    } else {
    }
    %c2_i32_24 = arith.constant 2 : i32
    %34 = arith.cmpi eq, %arg0, %c2_i32_24 : i32
    %35 = arith.extui %34 : i1 to i32
    %c0_i32_25 = arith.constant 0 : i32
    %36 = arith.cmpi ne, %35, %c0_i32_25 : i32
    scf.if %36 {
      %c0_26 = arith.constant 0 : index
      %c0_27 = arith.constant 0 : index
      %37 = vector.load %arg10[%c0_26, %c0_27] : memref<128x128xf32, #tpu.memory_space<vmem>>, vector<128x128xf32>
      tpu.vector_store %arg10[%c0_26, %c0_27], %30 {strides = array<i32>} : memref<128x128xf32, #tpu.memory_space<vmem>>, vector<128x128xf32>,
    } else {
    }
    return
  }
  func.func @transform_0(%arg0: i32) -> i32 {
    %c0_i32 = arith.constant 0 : i32
    %c0_i32_0 = arith.constant 0 : i32
    return %c0_i32 : i32
  }
  func.func @transform_1(%arg0: i32) -> i32 {
    %c0_i32 = arith.constant 0 : i32
    %c0_i32_0 = arith.constant 0 : i32
    return %c0_i32 : i32
  }
  func.func @transform_2(%arg0: i32) -> i32 {
    %c0_i32 = arith.constant 0 : i32
    %c0_i32_0 = arith.constant 0 : i32
    return %c0_i32 : i32
  }
  func.func @transform_4(%arg0: i32) -> (i32, i32, i32) {
    %c0_i32 = arith.constant 0 : i32
    %c0_i32_0 = arith.constant 0 : i32
    %c0_i32_1 = arith.constant 0 : i32
    return %arg0, %c0_i32, %c0_i32_0 : i32, i32, i32
  }
  func.func @transform_5(%arg0: i32) -> (i32, i32, i32) {
    %c0_i32 = arith.constant 0 : i32
    %c0_i32_0 = arith.constant 0 : i32
    %c0_i32_1 = arith.constant 0 : i32
    return %arg0, %c0_i32, %c0_i32_0 : i32, i32, i32
  }
  func.func @transform_6(%arg0: i32) -> (i32, i32, i32) {
    %c0_i32 = arith.constant 0 : i32
    %c0_i32_0 = arith.constant 0 : i32
    %c0_i32_1 = arith.constant 0 : i32
    return %arg0, %c0_i32, %c0_i32_0 : i32, i32, i32
  }
  func.func @transform_7(%arg0: i32) -> (i32, i32, i32) {
    %c0_i32 = arith.constant 0 : i32
    %c0_i32_0 = arith.constant 0 : i32
    %c0_i32_1 = arith.constant 0 : i32
    return %arg0, %c0_i32, %c0_i32_0 : i32, i32, i32
  }
  func.func @transform_8(%arg0: i32) -> (i32, i32, i32) {
    %c0_i32 = arith.constant 0 : i32
    %c0_i32_0 = arith.constant 0 : i32
    %c0_i32_1 = arith.constant 0 : i32
    return %arg0, %c0_i32, %c0_i32_0 : i32, i32, i32
  }
  func.func @transform_9(%arg0: i32) -> (i32, i32) {
    %c0_i32 = arith.constant 0 : i32
    %c0_i32_0 = arith.constant 0 : i32
    %c0_i32_1 = arith.constant 0 : i32
    return %c0_i32, %c0_i32_0 : i32, i32
  }
}

</mosaic_0001>

<bundles_post_ra>
// kernel: gnn_shared_enc_forward.1
= control target key start
LH: loop header
LB: loop body
LE: loop exit
PB: predicated region body
PF: predicated region fallthrough
CT: control target
= control target key end

     0   :  { %14 = vsyncpa [#allocation6], 0  ;;  %s1904_s0 = inlined_call_operand.vmem [shape: f32[3], index: 0, kind: input, shape index: {}]   ;;  %s1905_s1 = inlined_call_operand.vmem [shape: s32[256], index: 1, kind: input, shape index: {}]   ;;  %s1906_s2 = inlined_call_operand.vmem [shape: s32[256], index: 2, kind: input, shape index: {}]   ;;  %s1907_s3 = inlined_call_operand.hbm [shape: f32[128,128], index: 3, kind: input, shape index: {}, may-alias: {3,9}]   ;;  %s1908_s4 = inlined_call_operand.vmem [shape: f32[3,256,128], index: 4, kind: input, shape index: {}]   ;;  %s1909_s5 = inlined_call_operand.vmem [shape: bf16[3,128,256], index: 5, kind: input, shape index: {}]   ;;  %s1910_s6 = inlined_call_operand.vmem [shape: f32[3,1,256], index: 6, kind: input, shape index: {}]   ;;  %s1911_s7 = inlined_call_operand.vmem [shape: bf16[3,256,128], index: 7, kind: input, shape index: {}]   ;;  %s1912_s8 = inlined_call_operand.vmem [shape: f32[3,1,128], index: 8, kind: input, shape index: {}]   ;;  %s1913_s9 = inlined_call_operand.hbm [shape: f32[128,128], index: 9, kind: output, shape index: {}, may-alias: {3,9}]  }
   0x1   :  { %15 = vsyncpa [#allocation8], 0 }
   0x2   :  { %16 = vsyncpa [#allocation5], 0  ;;  %s1645_s30 = smov 0  }
   0x3 LB: > { %s1651_s10 = sadd.s32 4294967295, %s1582_s30   ;;  %p1206_p0 = scmp.ge.s32.totalorder %s1582_s30, 1  ;;  %s1582_s30 = sphi %s1645_s30, %s22_s30  }
   0x4   : > { %p241_p1 = scmp.lt.s32.totalorder %s1582_s30, 4  ;;  %s263_s13 = sshll.u32 %s1905_s1, 4  ;;  %s264_s13 = int_to_ptr.vmem [resolvable:$true] %s263_s13 }
   0x5   : > { %p1422_p3 = scmp.eq.s32.totalorder %s1651_s10, 0  ;;  %s253_s17 = sshll.u32 %s1904_s0, 4  ;;  %s254_s17 = int_to_ptr.vmem [resolvable:$true] %s253_s17 }
   0x6   : > { %p1658_p2 = pnand %p1206_p0, %p241_p1  ;;  %s273_s20 = sshll.u32 %s1906_s2, 4  ;;  %s274_s20 = int_to_ptr.vmem [resolvable:$true] %s273_s20 }
   0x7   : > { %s1588_s21 = smov [#allocation7]   ;;  %s1589_s22 = smov [#allocation4]  }
   0x8   : > { %p1412_p4 = pneg %p1658_p2  ;;  %s1590_s23 = smov [#allocation9]  }
   0xa   : > { %p1413_p5 = pnand %p1422_p3, %p1412_p4  ;;  %323 = sbr.rel (%p1658_p2) target bundleno = 525 (0x20d), region = 52 }
   0xc   : > { %1418 = dma.vmem_to_smem (!%p1413_p5), %s264_s13, 32, %s1588_s21, [#allocation8]  }
   0xd   : > { %1415 = dma.vmem_to_smem (!%p1413_p5), %s254_s17, 16, %s1589_s22, [#allocation6]  }
   0xe   : > { %1421 = dma.vmem_to_smem (!%p1413_p5), %s274_s20, 32, %s1590_s23, [#allocation8]  }
   0xf   : > { %1565 = dma.done.wait (%p1422_p3), [#allocation6], 16  }
  0x10   : > { %1567 = vsyncadd (%p1422_p3), [#allocation6], 4294967280 }
  0x11   : > { %1569 = dma.done.wait (%p1422_p3), [#allocation8], 64  }
  0x12   : > { %1571 = vsyncadd (%p1422_p3), [#allocation8], 4294967232 }
  0x13   : > { %340 = sfence }
  0x14   : > { %p381_p6 = scmp.lt.s32.totalorder %s1651_s10, 2  ;;  %s414_s26 = sshll.u32 %s1907_s3, 4  ;;  %s415_s26 = int_to_ptr.hbm [resolvable:$true] %s414_s26 }
  0x15   : > { %s1591_s28 = smov [#allocation10]  }
  0x16   : > { %s1688_s27 = scalar_select %p381_p6, %s1651_s10, 2 }
  0x17   : > { %s1690_s29 = sshll.u32 %s1591_s28, 4  ;;  %s417_s29 = int_to_ptr.vmem [resolvable:$true] %s1690_s29 }
  0x18   : > { %s1358_s11 = sshll.u32 %s1688_s27, 8  ;;  %s1359_s12 = sshll.u32 %s1688_s27, 7 }
  0x19   : > { %s1697_s15 = scalar_lea.vmem %s1908_s4, %s1358_s11  ;;  %s1702_s18 = scalar_lea.vmem %s1909_s5, %s1359_s12 }
  0x1a   : > { %s1219_s19 = sshll.u32 %s1688_s27, 1  ;;  %s1708_s22 = scalar_lea.vmem %s1911_s7, %s1359_s12 }
  0x1b   : > { %s1713_s25 = scalar_lea.vmem %s1910_s6, %s1219_s19  ;;  %s402_s11 = scalar_lea.vmem %s1912_s8, %s1688_s27 }
  0x1c   : > { %1406 = dma.hbm_to_vmem [thread:$0]  (%p1422_p3), %s415_s26, 2048, %s417_s29, [#allocation3] }
  0x1d   : > { %1573 = dma.done.wait (%p1422_p3), [#allocation3], 2048 }
  0x1e   : > { %1575 = vsyncadd (%p1422_p3), [#allocation3], 4294965248  ;;  %v1592_v0 = vmov 0.0   ;;  %s1584_s26 = smov 0  }
  0x1f   : > { %423 = vst [vmem:[#allocation2] sm:$0xff] %v1592_v0 }
  0x20   : > { %424 = vst [vmem:[#allocation2 + $0x8] sm:$0xff] %v1592_v0 }
  0x21   : > { %425 = vst [vmem:[#allocation2 + $0x10] sm:$0xff] %v1592_v0 }
  0x22   : > { %426 = vst [vmem:[#allocation2 + $0x18] sm:$0xff] %v1592_v0 }
  0x23   : > { %427 = vst [vmem:[#allocation2 + $0x20] sm:$0xff] %v1592_v0 }
  0x24   : > { %428 = vst [vmem:[#allocation2 + $0x28] sm:$0xff] %v1592_v0 }
  0x25   : > { %429 = vst [vmem:[#allocation2 + $0x30] sm:$0xff] %v1592_v0 }
  0x26   : > { %430 = vst [vmem:[#allocation2 + $0x38] sm:$0xff] %v1592_v0 }
  0x27   : > { %431 = vst [vmem:[#allocation2 + $0x40] sm:$0xff] %v1592_v0 }
  0x28   : > { %432 = vst [vmem:[#allocation2 + $0x48] sm:$0xff] %v1592_v0 }
  0x29   : > { %433 = vst [vmem:[#allocation2 + $0x50] sm:$0xff] %v1592_v0 }
  0x2a   : > { %434 = vst [vmem:[#allocation2 + $0x58] sm:$0xff] %v1592_v0 }
  0x2b   : > { %435 = vst [vmem:[#allocation2 + $0x60] sm:$0xff] %v1592_v0 }
  0x2c   : > { %436 = vst [vmem:[#allocation2 + $0x68] sm:$0xff] %v1592_v0 }
  0x2d   : > { %437 = vst [vmem:[#allocation2 + $0x70] sm:$0xff] %v1592_v0 }
  0x2e   : > { %438 = vst [vmem:[#allocation2 + $0x78] sm:$0xff] %v1592_v0 }
  0x2f LB: >> { %s445_s12 = sld [smem:[#allocation7 + %s1586_s26]]  ;;  %s449_s16 = scalar_lea.vmem %s1697_s15, %s1586_s26  ;;  %s1586_s26 = sphi %s1584_s26, %s444_s26  }
  0x30   : >> { %s446_s14 = sld [smem:[#allocation9 + %s1586_s26]]  ;;  %v450_v1 = vld [vmem:[%s449_s16] sm:$0x1]  ;;  %s444_s26 = sadd.s32 1, %s1586_s26  }
  0x31   : >> { %p441_p7 = scmp.ge.s32.totalorder %s444_s26, 256  }
  0x32   : > { %v1281_v7 = vld [vmem:[%s1702_s18 + $0x70] sm:$0xf] (%p441_p7)  ;;  %v1376_v8 = vld [vmem:[%s1702_s18 + $0x74] sm:$0xf0] (%p441_p7)  ;;  %v1375_v9 = vld [vmem:[%s1702_s18 + $0x74] sm:$0xf] (%p441_p7) }
  0x33   : > { %v1282_v10 = vor.u32 (%p441_p7), %v1376_v8, %v1281_v7  ;;  %v1283_v11 = vld [vmem:[%s1702_s18 + $0x78] sm:$0xf0] (%p441_p7)  ;;  %v1273_v12 = vld [vmem:[%s1702_s18 + $0x60] sm:$0xf] (%p441_p7)  ;;  %v1374_v13 = vld [vmem:[%s1702_s18 + $0x64] sm:$0xf0] (%p441_p7) }
  0x34   : > { %v1286_v14 = vor.u32 (%p441_p7), %v1375_v9, %v1283_v11  ;;  %v1373_v15 = vld [vmem:[%s1702_s18 + $0x64] sm:$0xf] (%p441_p7)  ;;  %v1275_v16 = vld [vmem:[%s1702_s18 + $0x68] sm:$0xf0] (%p441_p7)  ;;  %v1274_v17 = vor.u32 (%p441_p7), %v1374_v13, %v1273_v12  ;;  %v1265_v19 = vld [vmem:[%s1702_s18 + $0x50] sm:$0xf] (%p441_p7) }
  0x35   : >> { %s447_s17 = scalar_lea.vmem [#allocation10], %s445_s12  ;;  %633 = vmatpush.bf16.msra.mxu0 (%p441_p7), %v1282_v10  ;;  %v1278_v18 = vor.u32 (%p441_p7), %v1373_v15, %v1275_v16  ;;  %v1372_v20 = vld [vmem:[%s1702_s18 + $0x54] sm:$0xf0] (%p441_p7)  ;;  %v1371_v21 = vld [vmem:[%s1702_s18 + $0x54] sm:$0xf] (%p441_p7)  ;;  %s473_s15 = sld [smem:[#allocation4 + %s1651_s10]] (%p441_p7) }
  0x36   : >> { %v448_v2 = vld [vmem:[%s447_s17] sm:$0x1]  ;;  %s453_s19 = scalar_lea.vmem [#allocation2], %s446_s14  ;;  %682 = vmatpush.bf16.msra.mxu1 (%p441_p7), %v1286_v14  ;;  %v1267_v22 = vld [vmem:[%s1702_s18 + $0x58] sm:$0xf0] (%p441_p7)  ;;  %v1266_v23 = vor.u32 (%p441_p7), %v1372_v20, %v1265_v19  ;;  %v458_v43 = vld [vmem:[#allocation10 + $0x8] sm:$0xff] (%p441_p7) }
  0x37   : >> { %v451_v3 = vadd.f32 %v450_v1, %v448_v2  ;;  %v454_v4 = vld [vmem:[%s453_s19] sm:$0x1]  ;;  %v1270_v24 = vor.u32 (%p441_p7), %v1371_v21, %v1267_v22  ;;  %v1370_v26 = vld [vmem:[%s1702_s18 + $0x44] sm:$0xf0] (%p441_p7)  ;;  %v1369_v27 = vld [vmem:[%s1702_s18 + $0x44] sm:$0xf] (%p441_p7) }
  0x38   : > { %v1257_v25 = vld [vmem:[%s1702_s18 + $0x40] sm:$0xf] (%p441_p7)  ;;  %v1259_v28 = vld [vmem:[%s1702_s18 + $0x48] sm:$0xf0] (%p441_p7)  ;;  %v1249_v31 = vld [vmem:[%s1702_s18 + $0x30] sm:$0xf] (%p441_p7) }
  0x39   : >> { %v452_v5 = vmax.f32 %v451_v3, 0.0  ;;  %443 = sbr.rel (!%p441_p7) target bundleno = 47 (0x2f), region = 130  ;;  %634 = vmatpush.bf16.msra.mxu0 (%p441_p7), %v1274_v17  ;;  %v1258_v29 = vor.u32 (%p441_p7), %v1370_v26, %v1257_v25  ;;  %v1262_v30 = vor.u32 (%p441_p7), %v1369_v27, %v1259_v28  ;;  %v1368_v32 = vld [vmem:[%s1702_s18 + $0x34] sm:$0xf0] (%p441_p7)  ;;  %v1367_v33 = vld [vmem:[%s1702_s18 + $0x34] sm:$0xf] (%p441_p7) }
  0x3a   : > { %683 = vmatpush.bf16.msra.mxu1 (%p441_p7), %v1278_v18  ;;  %v1251_v34 = vld [vmem:[%s1702_s18 + $0x38] sm:$0xf0] (%p441_p7)  ;;  %v1250_v35 = vor.u32 (%p441_p7), %v1368_v32, %v1249_v31  ;;  %v1241_v37 = vld [vmem:[%s1702_s18 + $0x20] sm:$0xf] (%p441_p7)  ;;  %v1366_v38 = vld [vmem:[%s1702_s18 + $0x24] sm:$0xf0] (%p441_p7) }
  0x3b   : >> { %v455_v6 = vadd.f32 %v454_v4, %v452_v5  ;;  %v1254_v36 = vor.u32 (%p441_p7), %v1367_v33, %v1251_v34  ;;  %v1365_v39 = vld [vmem:[%s1702_s18 + $0x24] sm:$0xf] (%p441_p7)  ;;  %v1243_v40 = vld [vmem:[%s1702_s18 + $0x28] sm:$0xf0] (%p441_p7)  ;;  %v1242_v41 = vor.u32 (%p441_p7), %v1366_v38, %v1241_v37  ;;  %v1754_v44 = vstv (%p441_p7), %s473_s15  ;;  %v1233_v46 = vld [vmem:[%s1702_s18 + $0x10] sm:$0xf] (%p441_p7) }
  0x3c   : > { %v457_v42 = vld [vmem:[#allocation10] sm:$0xff] (%p441_p7)  ;;  %v1246_v45 = vor.u32 (%p441_p7), %v1365_v39, %v1243_v40  ;;  %v1364_v47 = vld [vmem:[%s1702_s18 + $0x14] sm:$0xf0] (%p441_p7)  ;;  %v1363_v48 = vld [vmem:[%s1702_s18 + $0x14] sm:$0xf] (%p441_p7)  ;;  %v476_v51 = vmul.f32 (%p441_p7), %v1754_v44, %v458_v43  ;;  %p1351_p8 = scmp.eq.s32.totalorder (%p441_p7), %s1651_s10, 2 }
  0x3d   : >> { %456 = vst [vmem:[%s453_s19] sm:$0x1] %v455_v6  ;;  %635 = vmatpush.bf16.msra.mxu0 (%p441_p7), %v1266_v23  ;;  %v1235_v49 = vld [vmem:[%s1702_s18 + $0x18] sm:$0xf0] (%p441_p7)  ;;  %v475_v50 = vmul.f32 (%p441_p7), %v1754_v44, %v457_v42  ;;  %v1234_v52 = vor.u32 (%p441_p7), %v1364_v47, %v1233_v46  ;;  %v1225_v56 = vld [vmem:[%s1702_s18] sm:$0xf] (%p441_p7)  ;;  %v459_v1 = vld [vmem:[#allocation10 + $0x10] sm:$0xff] (%p441_p7) }
  0x3e   : > { %684 = vmatpush.bf16.msra.mxu1 %v1270_v24  ;;  %v1238_v55 = vor.u32 %v1363_v48, %v1235_v49  ;;  %v1362_v57 = vld [vmem:[%s1702_s18 + $0x4] sm:$0xf0]  ;;  %v1361_v58 = vld [vmem:[%s1702_s18 + $0x4] sm:$0xf]  ;;  %v1227_v59 = vld [vmem:[%s1702_s18 + $0x8] sm:$0xf0]  ;;  %v477_v3 = vmul.f32 %v1754_v44, %v459_v1 }
  0x3f   : > { %v1226_v62 = vor.u32 %v1362_v57, %v1225_v56  ;;  %v1230_v63 = vor.u32 %v1361_v58, %v1227_v59  ;;  %v460_v2 = vld [vmem:[#allocation10 + $0x18] sm:$0xff]  ;;  %v461_v10 = vld [vmem:[#allocation10 + $0x20] sm:$0xff]  ;;  %v462_v11 = vld [vmem:[#allocation10 + $0x28] sm:$0xff] }
  0x40   : > { %v478_v4 = vmul.f32 %v1754_v44, %v460_v2  ;;  %v479_v12 = vmul.f32 %v1754_v44, %v461_v10  ;;  %v480_v13 = vmul.f32 %v1754_v44, %v462_v11  ;;  %v463_v19 = vld [vmem:[#allocation10 + $0x30] sm:$0xff]  ;;  %v464_v20 = vld [vmem:[#allocation10 + $0x38] sm:$0xff]  ;;  %v465_v28 = vld [vmem:[#allocation10 + $0x40] sm:$0xff] }
  0x41   : > { %636 = vmatpush.bf16.msra.mxu0 %v1258_v29  ;;  %v481_v21 = vmul.f32 %v1754_v44, %v463_v19  ;;  %v482_v22 = vmul.f32 %v1754_v44, %v464_v20  ;;  %v466_v29 = vld [vmem:[#allocation10 + $0x48] sm:$0xff]  ;;  %v467_v37 = vld [vmem:[#allocation10 + $0x50] sm:$0xff]  ;;  %v468_v38 = vld [vmem:[#allocation10 + $0x58] sm:$0xff] }
  0x42   : > { %685 = vmatpush.bf16.msra.mxu1 %v1262_v30  ;;  %v483_v30 = vmul.f32 %v1754_v44, %v465_v28  ;;  %v484_v31 = vmul.f32 %v1754_v44, %v466_v29  ;;  %v1384_v39 = vld [vmem:[%s1708_s22 + $0x38] sm:$0xff]  ;;  %v486_v42 = vmul.f32 %v1754_v44, %v468_v38  ;;  %v1383_v49 = vld [vmem:[%s1708_s22 + $0x30] sm:$0xff]  ;;  %v1381_v59 = vld [vmem:[%s1708_s22 + $0x20] sm:$0xff] }
  0x43   : > { %v1392_v40 = vld [vmem:[%s1708_s22 + $0x78] sm:$0xff]  ;;  %911 = vmatpush.bf16.msra.mxu2 %v1384_v39  ;;  %v1379_v2 = vld [vmem:[%s1708_s22 + $0x10] sm:$0xff] }
  0x44   : > { %v491_v53 = vld [vmem:[#allocation2] sm:$0xff]  ;;  %v492_v54 = vld [vmem:[#allocation2 + $0x8] sm:$0xff]  ;;  %v493_v5 = vld [vmem:[#allocation2 + $0x10] sm:$0xff]  ;;  %960 = vmatpush.bf16.msra.mxu3 %v1392_v40 }
  0x45   : > { %637 = vmatpush.bf16.msra.mxu0 %v1250_v35  ;;  %v507_v60 = vadd.f32 %v491_v53, %v475_v50  ;;  %v508_v61 = vadd.f32 %v492_v54, %v476_v51  ;;  %v494_v6 = vld [vmem:[#allocation2 + $0x18] sm:$0xff]  ;;  %v509_v7 = vadd.f32 %v493_v5, %v477_v3  ;;  %v495_v14 = vld [vmem:[#allocation2 + $0x20] sm:$0xff]  ;;  %v496_v15 = vld [vmem:[#allocation2 + $0x28] sm:$0xff] }
  0x46   : > { %686 = vmatpush.bf16.msra.mxu1 %v1254_v36  ;;  %v510_v8 = vadd.f32 %v494_v6, %v478_v4  ;;  %v511_v16 = vadd.f32 %v495_v14, %v479_v12  ;;  %v512_v17 = vadd.f32 %v496_v15, %v480_v13  ;;  %v497_v23 = vld [vmem:[#allocation2 + $0x30] sm:$0xff]  ;;  %v498_v24 = vld [vmem:[#allocation2 + $0x38] sm:$0xff]  ;;  %v499_v32 = vld [vmem:[#allocation2 + $0x40] sm:$0xff] }
  0x47   : > { %v523_v0 = vpack.c.bf16 %v508_v61, %v507_v60  ;;  %v513_v25 = vadd.f32 %v497_v23, %v481_v21  ;;  %v514_v26 = vadd.f32 %v498_v24, %v482_v22  ;;  %v500_v33 = vld [vmem:[#allocation2 + $0x48] sm:$0xff]  ;;  %v515_v34 = vadd.f32 %v499_v32, %v483_v30  ;;  %v501_v43 = vld [vmem:[#allocation2 + $0x50] sm:$0xff]  ;;  %v469_v51 = vld [vmem:[#allocation10 + $0x60] sm:$0xff]  ;;  %912 = vmatpush.bf16.msra.mxu2 %v1383_v49 }
  0x48   : > { %v524_v9 = vpack.c.bf16 %v510_v8, %v509_v7  ;;  %v525_v18 = vpack.c.bf16 %v512_v17, %v511_v16  ;;  %v516_v35 = vadd.f32 %v500_v33, %v484_v31  ;;  %v1391_v50 = vld [vmem:[%s1708_s22 + $0x70] sm:$0xff]  ;;  %v1382_v53 = vld [vmem:[%s1708_s22 + $0x28] sm:$0xff]  ;;  %v503_v57 = vld [vmem:[#allocation2 + $0x60] sm:$0xff] }
  0x49   : > { %638 = vmatpush.bf16.msra.mxu0 %v1242_v41  ;;  %v526_v27 = vpack.c.bf16 %v514_v26, %v513_v25  ;;  %v485_v41 = vmul.f32 %v1754_v44, %v467_v37  ;;  %961 = vmatpush.bf16.msra.mxu3 %v1391_v50  ;;  %v1390_v54 = vld [vmem:[%s1708_s22 + $0x68] sm:$0xff]  ;;  %v1389_v60 = vld [vmem:[%s1708_s22 + $0x60] sm:$0xff]  ;;  %v1388_v1 = vld [vmem:[%s1708_s22 + $0x58] sm:$0xff] }
  0x4a   : > { %687 = vmatpush.bf16.msra.mxu1 %v1246_v45  ;;  %v527_v36 = vpack.c.bf16 %v516_v35, %v515_v34  ;;  %v502_v45 = vld [vmem:[#allocation2 + $0x58] sm:$0xff]  ;;  %v504_v58 = vld [vmem:[#allocation2 + $0x68] sm:$0xff]  ;;  %v1387_v3 = vld [vmem:[%s1708_s22 + $0x50] sm:$0xff] }
  0x4b   : > { %v517_v46 = vadd.f32 %v501_v43, %v485_v41  ;;  %v518_v47 = vadd.f32 %v502_v45, %v486_v42  ;;  %913 = vmatpush.bf16.msra.mxu2 %v1382_v53  ;;  %v471_v4 = vld [vmem:[#allocation10 + $0x70] sm:$0xff]  ;;  %v472_v5 = vld [vmem:[#allocation10 + $0x78] sm:$0xff]  ;;  %v1378_v8 = vld [vmem:[%s1708_s22 + $0x8] sm:$0xff] }
  0x4c   : > { %v489_v6 = vmul.f32 %v1754_v44, %v471_v4  ;;  %v490_v7 = vmul.f32 %v1754_v44, %v472_v5  ;;  %v505_v10 = vld [vmem:[#allocation2 + $0x70] sm:$0xff]  ;;  %v506_v11 = vld [vmem:[#allocation2 + $0x78] sm:$0xff]  ;;  %v1377_v14 = vld [vmem:[%s1708_s22] sm:$0xff] }
  0x4d   : > { %639 = vmatpush.bf16.msra.mxu0 %v1234_v52  ;;  %v528_v48 = vpack.c.bf16 %v518_v47, %v517_v46  ;;  %v470_v52 = vld [vmem:[#allocation10 + $0x68] sm:$0xff]  ;;  %962 = vmatpush.bf16.msra.mxu3 %v1390_v54  ;;  %v1385_v15 = vld [vmem:[%s1708_s22 + $0x40] sm:$0xff] }
  0x4e   : > { %688 = vmatpush.bf16.msra.mxu1 %v1238_v55  ;;  %v487_v55 = vmul.f32 %v1754_v44, %v469_v51  ;;  %v488_v56 = vmul.f32 %v1754_v44, %v470_v52  ;;  %v521_v12 = vadd.f32 %v505_v10, %v489_v6  ;;  %v522_v13 = vadd.f32 %v506_v11, %v490_v7  ;;  %v547_v17 = vld [vmem:[%s1713_s25] sm:$0x3] }
  0x4f   : > { %914 = vmatpush.bf16.msra.mxu2 %v1381_v59  ;;  %v1797_v44 = vperm.slane %v547_v17, 0  ;;  %v1799_v20 = vperm.slane %v547_v17, 1 }
  0x50   : > { %v519_v61 = vadd.f32 %v503_v57, %v487_v55  ;;  %v530_v16 = vpack.c.bf16 %v522_v13, %v521_v12 }
  0x51   : > { %640 = vmatpush.bf16.msra.mxu0 %v1226_v62  ;;  %v520_v62 = vadd.f32 %v504_v58, %v488_v56  ;;  %963 = vmatpush.bf16.msra.mxu3 %v1389_v60 }
  0x52   : > { %689 = vmatpush.bf16.msra.mxu1 %v1230_v63 }
  0x53   : > { %v529_v63 = vpack.c.bf16 %v520_v62, %v519_v61 }
  0x54   : > { %641 = vmatmul.bf16.vlgmr.msra.gmra.mxu0 %v523_v0 }
  0x55   : > { %690 = vmatmul.bf16.vlgmr.msra.gmra.mxu1 %v523_v0  ;;  %v1380_v0 = vld [vmem:[%s1708_s22 + $0x18] sm:$0xff]  ;;  %964 = vmatpush.bf16.msra.mxu3 %v1388_v1 }
  0x56   : > { %915 = vmatpush.bf16.msra.mxu2 %v1380_v0 }
  0x59   : > { %965 = vmatpush.bf16.msra.mxu3 %v1387_v3 }
  0x5a   : > { %916 = vmatpush.bf16.msra.mxu2 %v1379_v2 }
  0x5e   : > { %917 = vmatpush.bf16.msra.mxu2 %v1378_v8 }
  0x62   : > { %918 = vmatpush.bf16.msra.mxu2 %v1377_v14 }
  0x64   : > { %646 = vmatmul.bf16.gmra.mxu0 %v524_v9 }
  0x65   : > { %695 = vmatmul.bf16.gmra.mxu1 %v524_v9  ;;  %v1386_v9 = vld [vmem:[%s1708_s22 + $0x48] sm:$0xff] }
  0x66   : > { %966 = vmatpush.bf16.msra.mxu3 %v1386_v9 }
  0x6a   : > { %967 = vmatpush.bf16.msra.mxu3 %v1385_v15 }
  0x74   : > { %651 = vmatmul.bf16.gmra.mxu0 %v525_v18 }
  0x75   : > { %700 = vmatmul.bf16.gmra.mxu1 %v525_v18 }
  0x84   : > { %656 = vmatmul.bf16.gmra.mxu0 %v526_v27 }
  0x85   : > { %705 = vmatmul.bf16.gmra.mxu1 %v526_v27 }
  0x94   : > { %661 = vmatmul.bf16.gmra.mxu0 %v527_v36 }
  0x95   : > { %710 = vmatmul.bf16.gmra.mxu1 %v527_v36 }
  0xa4   : > { %666 = vmatmul.bf16.gmra.mxu0 %v528_v48 }
  0xa5   : > { %715 = vmatmul.bf16.gmra.mxu1 %v528_v48 }
  0xb4   : > { %671 = vmatmul.bf16.gmra.mxu0 %v529_v63 }
  0xb5   : > { %720 = vmatmul.bf16.gmra.mxu1 %v529_v63 }
  0xc4   : > { %676 = vmatmul.bf16.gmra.mxu0 %v530_v16 }
  0xc5   : > { %725 = vmatmul.bf16.gmra.mxu1 %v530_v16 }
  0xd1   : > { %v642_v18 = vpop.f32.mrf.mxu0 }
  0xd2   : > { %v691_v19 = vpop.f32.mrf.mxu1  ;;  %v643_v21 = vadd.f32 %v642_v18, %v1797_v44 }
  0xd3   : > { %v692_v22 = vadd.f32 %v691_v19, %v1799_v20 }
  0xd4   : > { %v731_v27 = vmax.f32 %v643_v21, 0.0 }
  0xd5   : > { %v732_v29 = vmax.f32 %v692_v22, 0.0 }
  0xd9   : > { %v644_v23 = vpop.f32.mrf.mxu0 }
  0xda   : > { %v645_v24 = vadd.f32 %v644_v23, %v1797_v44  ;;  %v693_v25 = vpop.f32.mrf.mxu1 }
  0xdb   : > { %v694_v26 = vadd.f32 %v693_v25, %v1799_v20 }
  0xdc   : > { %v733_v28 = vmax.f32 %v645_v24, 0.0 }
  0xdd   : > { %v734_v30 = vmax.f32 %v694_v26, 0.0 }
  0xde   : > { %v763_v31 = vpack.c.bf16 %v733_v28, %v731_v27 }
  0xdf   : > { %v764_v32 = vpack.c.bf16 %v734_v30, %v732_v29 }
  0xe0   : > { %919 = vmatmul.bf16.vlgmr.msra.gmra.mxu2 %v763_v31 }
  0xe1   : > { %968 = vmatmul.bf16.vlgmr.msra.gmra.mxu3 %v764_v32  ;;  %v647_v33 = vpop.f32.mrf.mxu0 }
  0xe2   : > { %v696_v34 = vpop.f32.mrf.mxu1  ;;  %v648_v35 = vadd.f32 %v647_v33, %v1797_v44 }
  0xe3   : > { %v697_v36 = vadd.f32 %v696_v34, %v1799_v20 }
  0xe4   : > { %v735_v41 = vmax.f32 %v648_v35, 0.0 }
  0xe5   : > { %v736_v43 = vmax.f32 %v697_v36, 0.0 }
  0xe9   : > { %v649_v37 = vpop.f32.mrf.mxu0 }
  0xea   : > { %v650_v38 = vadd.f32 %v649_v37, %v1797_v44  ;;  %v698_v39 = vpop.f32.mrf.mxu1 }
  0xeb   : > { %v699_v40 = vadd.f32 %v698_v39, %v1799_v20 }
  0xec   : > { %v737_v42 = vmax.f32 %v650_v38, 0.0 }
  0xed   : > { %v738_v45 = vmax.f32 %v699_v40, 0.0 }
  0xee   : > { %v765_v46 = vpack.c.bf16 %v737_v42, %v735_v41 }
  0xef   : > { %v766_v47 = vpack.c.bf16 %v738_v45, %v736_v43 }
  0xf0   : > { %924 = vmatmul.bf16.gmra.mxu2 %v765_v46 }
  0xf1   : > { %973 = vmatmul.bf16.gmra.mxu3 %v766_v47  ;;  %v652_v48 = vpop.f32.mrf.mxu0 }
  0xf2   : > { %v701_v49 = vpop.f32.mrf.mxu1  ;;  %v653_v50 = vadd.f32 %v652_v48, %v1797_v44 }
  0xf3   : > { %v702_v51 = vadd.f32 %v701_v49, %v1799_v20 }
  0xf4   : > { %v739_v56 = vmax.f32 %v653_v50, 0.0 }
  0xf5   : > { %v740_v58 = vmax.f32 %v702_v51, 0.0 }
  0xf9   : > { %v654_v52 = vpop.f32.mrf.mxu0 }
  0xfa   : > { %v655_v53 = vadd.f32 %v654_v52, %v1797_v44  ;;  %v703_v54 = vpop.f32.mrf.mxu1 }
  0xfb   : > { %v704_v55 = vadd.f32 %v703_v54, %v1799_v20 }
  0xfc   : > { %v741_v57 = vmax.f32 %v655_v53, 0.0 }
  0xfd   : > { %v742_v59 = vmax.f32 %v704_v55, 0.0 }
  0xfe   : > { %v767_v60 = vpack.c.bf16 %v741_v57, %v739_v56 }
  0xff   : > { %v768_v61 = vpack.c.bf16 %v742_v59, %v740_v58 }
 0x100   : > { %929 = vmatmul.bf16.gmra.mxu2 %v767_v60 }
 0x101   : > { %978 = vmatmul.bf16.gmra.mxu3 %v768_v61  ;;  %v657_v62 = vpop.f32.mrf.mxu0 }
 0x102   : > { %v706_v63 = vpop.f32.mrf.mxu1  ;;  %v658_v0 = vadd.f32 %v657_v62, %v1797_v44 }
 0x103   : > { %v707_v1 = vadd.f32 %v706_v63, %v1799_v20 }
 0x104   : > { %v743_v6 = vmax.f32 %v658_v0, 0.0 }
 0x105   : > { %v744_v8 = vmax.f32 %v707_v1, 0.0 }
 0x109   : > { %v659_v2 = vpop.f32.mrf.mxu0 }
 0x10a   : > { %v660_v3 = vadd.f32 %v659_v2, %v1797_v44  ;;  %v708_v4 = vpop.f32.mrf.mxu1 }
 0x10b   : > { %v709_v5 = vadd.f32 %v708_v4, %v1799_v20 }
 0x10c   : > { %v745_v7 = vmax.f32 %v660_v3, 0.0 }
 0x10d   : > { %v746_v9 = vmax.f32 %v709_v5, 0.0 }
 0x10e   : > { %v769_v10 = vpack.c.bf16 %v745_v7, %v743_v6  ;;  %v1454_v6 = vld [vmem:[%s402_s11] ss:$0 sm:$0xff] }
 0x10f   : > { %v770_v11 = vpack.c.bf16 %v746_v9, %v744_v8 }
 0x110   : > { %934 = vmatmul.bf16.gmra.mxu2 %v769_v10 }
 0x111   : > { %983 = vmatmul.bf16.gmra.mxu3 %v770_v11  ;;  %v662_v12 = vpop.f32.mrf.mxu0 }
 0x112   : > { %v711_v13 = vpop.f32.mrf.mxu1  ;;  %v663_v14 = vadd.f32 %v662_v12, %v1797_v44 }
 0x113   : > { %v712_v15 = vadd.f32 %v711_v13, %v1799_v20 }
 0x114   : > { %v747_v21 = vmax.f32 %v663_v14, 0.0 }
 0x115   : > { %v748_v23 = vmax.f32 %v712_v15, 0.0 }
 0x119   : > { %v664_v16 = vpop.f32.mrf.mxu0 }
 0x11a   : > { %v665_v17 = vadd.f32 %v664_v16, %v1797_v44  ;;  %v713_v18 = vpop.f32.mrf.mxu1 }
 0x11b   : > { %v714_v19 = vadd.f32 %v713_v18, %v1799_v20 }
 0x11c   : > { %v749_v22 = vmax.f32 %v665_v17, 0.0 }
 0x11d   : > { %v750_v24 = vmax.f32 %v714_v19, 0.0 }
 0x11e   : > { %v771_v25 = vpack.c.bf16 %v749_v22, %v747_v21 }
 0x11f   : > { %v772_v26 = vpack.c.bf16 %v750_v24, %v748_v23 }
 0x120   : > { %939 = vmatmul.bf16.gmra.mxu2 %v771_v25 }
 0x121   : > { %988 = vmatmul.bf16.gmra.mxu3 %v772_v26  ;;  %v667_v27 = vpop.f32.mrf.mxu0 }
 0x122   : > { %v716_v28 = vpop.f32.mrf.mxu1  ;;  %v668_v29 = vadd.f32 %v667_v27, %v1797_v44 }
 0x123   : > { %v717_v30 = vadd.f32 %v716_v28, %v1799_v20 }
 0x124   : > { %v751_v35 = vmax.f32 %v668_v29, 0.0 }
 0x125   : > { %v752_v37 = vmax.f32 %v717_v30, 0.0 }
 0x129   : > { %v669_v31 = vpop.f32.mrf.mxu0 }
 0x12a   : > { %v670_v32 = vadd.f32 %v669_v31, %v1797_v44  ;;  %v718_v33 = vpop.f32.mrf.mxu1 }
 0x12b   : > { %v719_v34 = vadd.f32 %v718_v33, %v1799_v20 }
 0x12c   : > { %v753_v36 = vmax.f32 %v670_v32, 0.0 }
 0x12d   : > { %v754_v38 = vmax.f32 %v719_v34, 0.0 }
 0x12e   : > { %v773_v39 = vpack.c.bf16 %v753_v36, %v751_v35 }
 0x12f   : > { %v774_v40 = vpack.c.bf16 %v754_v38, %v752_v37 }
 0x130   : > { %944 = vmatmul.bf16.gmra.mxu2 %v773_v39 }
 0x131   : > { %993 = vmatmul.bf16.gmra.mxu3 %v774_v40  ;;  %v672_v41 = vpop.f32.mrf.mxu0 }
 0x132   : > { %v721_v42 = vpop.f32.mrf.mxu1  ;;  %v673_v43 = vadd.f32 %v672_v41, %v1797_v44 }
 0x133   : > { %v722_v45 = vadd.f32 %v721_v42, %v1799_v20 }
 0x134   : > { %v755_v50 = vmax.f32 %v673_v43, 0.0 }
 0x135   : > { %v756_v52 = vmax.f32 %v722_v45, 0.0 }
 0x139   : > { %v674_v46 = vpop.f32.mrf.mxu0 }
 0x13a   : > { %v675_v47 = vadd.f32 %v674_v46, %v1797_v44  ;;  %v723_v48 = vpop.f32.mrf.mxu1 }
 0x13b   : > { %v724_v49 = vadd.f32 %v723_v48, %v1799_v20 }
 0x13c   : > { %v757_v51 = vmax.f32 %v675_v47, 0.0 }
 0x13d   : > { %v758_v53 = vmax.f32 %v724_v49, 0.0 }
 0x13e   : > { %v775_v54 = vpack.c.bf16 %v757_v51, %v755_v50 }
 0x13f   : > { %v776_v55 = vpack.c.bf16 %v758_v53, %v756_v52 }
 0x140   : > { %949 = vmatmul.bf16.gmra.mxu2 %v775_v54 }
 0x141   : > { %998 = vmatmul.bf16.gmra.mxu3 %v776_v55  ;;  %v677_v56 = vpop.f32.mrf.mxu0 }
 0x142   : > { %v726_v57 = vpop.f32.mrf.mxu1  ;;  %v678_v58 = vadd.f32 %v677_v56, %v1797_v44 }
 0x143   : > { %v727_v59 = vadd.f32 %v726_v57, %v1799_v20 }
 0x144   : > { %v759_v0 = vmax.f32 %v678_v58, 0.0 }
 0x145   : > { %v760_v2 = vmax.f32 %v727_v59, 0.0 }
 0x149   : > { %v679_v60 = vpop.f32.mrf.mxu0 }
 0x14a   : > { %v680_v61 = vadd.f32 %v679_v60, %v1797_v44  ;;  %v728_v62 = vpop.f32.mrf.mxu1 }
 0x14b   : > { %v729_v63 = vadd.f32 %v728_v62, %v1799_v20 }
 0x14c   : > { %v761_v1 = vmax.f32 %v680_v61, 0.0 }
 0x14d   : > { %v762_v3 = vmax.f32 %v729_v63, 0.0 }
 0x14e   : > { %v777_v4 = vpack.c.bf16 %v761_v1, %v759_v0 }
 0x14f   : > { %v778_v5 = vpack.c.bf16 %v762_v3, %v760_v2 }
 0x150   : > { %954 = vmatmul.bf16.gmra.mxu2 %v777_v4 }
 0x151   : > { %1003 = vmatmul.bf16.gmra.mxu3 %v778_v5 }
 0x163   : > { %v920_v7 = vpop.f32.mrf.mxu2 }
 0x164   : > { %v921_v8 = vadd.f32 %v1454_v6, %v920_v7  ;;  %v969_v9 = vpop.f32.mrf.mxu3 }
 0x166   : > { %v1838_v44 = vadd.f32 %v969_v9, %v921_v8 }
 0x16b   : > { %v922_v10 = vpop.f32.mrf.mxu2 }
 0x16c   : > { %v923_v20 = vadd.f32 %v1454_v6, %v922_v10  ;;  %v971_v11 = vpop.f32.mrf.mxu3 }
 0x16e   : > { %v1840_v12 = vadd.f32 %v971_v11, %v923_v20 }
 0x173   : > { %v925_v13 = vpop.f32.mrf.mxu2 }
 0x174   : > { %v926_v14 = vadd.f32 %v1454_v6, %v925_v13  ;;  %v974_v15 = vpop.f32.mrf.mxu3 }
 0x176   : > { %v1842_v16 = vadd.f32 %v974_v15, %v926_v14 }
 0x17b   : > { %v927_v17 = vpop.f32.mrf.mxu2 }
 0x17c   : > { %v928_v18 = vadd.f32 %v1454_v6, %v927_v17  ;;  %v976_v19 = vpop.f32.mrf.mxu3 }
 0x17e   : > { %v1844_v21 = vadd.f32 %v976_v19, %v928_v18 }
 0x183   : > { %v930_v22 = vpop.f32.mrf.mxu2 }
 0x184   : > { %v931_v23 = vadd.f32 %v1454_v6, %v930_v22  ;;  %v979_v24 = vpop.f32.mrf.mxu3 }
 0x186   : > { %v1846_v25 = vadd.f32 %v979_v24, %v931_v23 }
 0x18b   : > { %v932_v26 = vpop.f32.mrf.mxu2 }
 0x18c   : > { %v933_v27 = vadd.f32 %v1454_v6, %v932_v26  ;;  %v981_v28 = vpop.f32.mrf.mxu3 }
 0x18e   : > { %v1848_v29 = vadd.f32 %v981_v28, %v933_v27 }
 0x193   : > { %v935_v30 = vpop.f32.mrf.mxu2 }
 0x194   : > { %v936_v31 = vadd.f32 %v1454_v6, %v935_v30  ;;  %v984_v32 = vpop.f32.mrf.mxu3 }
 0x196   : > { %v1850_v33 = vadd.f32 %v984_v32, %v936_v31 }
 0x19b   : > { %v937_v34 = vpop.f32.mrf.mxu2 }
 0x19c   : > { %v938_v35 = vadd.f32 %v1454_v6, %v937_v34  ;;  %v986_v36 = vpop.f32.mrf.mxu3 }
 0x19e   : > { %v1852_v37 = vadd.f32 %v986_v36, %v938_v35 }
 0x1a3   : > { %v940_v38 = vpop.f32.mrf.mxu2 }
 0x1a4   : > { %v941_v39 = vadd.f32 %v1454_v6, %v940_v38  ;;  %v989_v40 = vpop.f32.mrf.mxu3 }
 0x1a6   : > { %v1854_v41 = vadd.f32 %v989_v40, %v941_v39 }
 0x1ab   : > { %v942_v42 = vpop.f32.mrf.mxu2 }
 0x1ac   : > { %v943_v43 = vadd.f32 %v1454_v6, %v942_v42  ;;  %v991_v45 = vpop.f32.mrf.mxu3 }
 0x1ae   : > { %v1856_v46 = vadd.f32 %v991_v45, %v943_v43 }
 0x1b3   : > { %v945_v47 = vpop.f32.mrf.mxu2 }
 0x1b4   : > { %v946_v48 = vadd.f32 %v1454_v6, %v945_v47  ;;  %v994_v49 = vpop.f32.mrf.mxu3 }
 0x1b6   : > { %v1858_v50 = vadd.f32 %v994_v49, %v946_v48 }
 0x1bb   : > { %v947_v51 = vpop.f32.mrf.mxu2 }
 0x1bc   : > { %v948_v52 = vadd.f32 %v1454_v6, %v947_v51  ;;  %v996_v53 = vpop.f32.mrf.mxu3 }
 0x1be   : > { %v1860_v54 = vadd.f32 %v996_v53, %v948_v52 }
 0x1c3   : > { %v950_v55 = vpop.f32.mrf.mxu2 }
 0x1c4   : > { %v951_v56 = vadd.f32 %v1454_v6, %v950_v55  ;;  %v999_v57 = vpop.f32.mrf.mxu3 }
 0x1c6   : > { %v1000_v58 = vadd.f32 %v999_v57, %v951_v56 }
 0x1cb   : > { %v952_v59 = vpop.f32.mrf.mxu2 }
 0x1cc   : > { %v953_v60 = vadd.f32 %v1454_v6, %v952_v59  ;;  %v1001_v61 = vpop.f32.mrf.mxu3 }
 0x1ce   : > { %v1002_v62 = vadd.f32 %v1001_v61, %v953_v60 }
 0x1d3   : > { %v955_v63 = vpop.f32.mrf.mxu2 }
 0x1d4   : > { %v956_v0 = vadd.f32 %v1454_v6, %v955_v63  ;;  %v1004_v1 = vpop.f32.mrf.mxu3 }
 0x1d6   : > { %v1005_v2 = vadd.f32 %v1004_v1, %v956_v0 }
 0x1da   : > { %1012 = sbr.rel (%p1351_p8) target bundleno = 497 (0x1f1), region = 83 }
 0x1db   : > { %v957_v3 = vpop.f32.mrf.mxu2 }
 0x1dc   : > { %v958_v4 = vadd.f32 %v1454_v6, %v957_v3  ;;  %v1006_v5 = vpop.f32.mrf.mxu3 }
 0x1de   : > { %v1007_v7 = vadd.f32 %v1006_v5, %v958_v4 }
 0x1df   : > { %v1013_v8 = vmax.f32 %v1838_v44, 0.0  ;;  %v1014_v9 = vmax.f32 %v1840_v12, 0.0  ;;  %v1015_v10 = vmax.f32 %v1842_v16, 0.0  ;;  %v1016_v20 = vmax.f32 %v1844_v21, 0.0 }
 0x1e0   : > { %v1017_v11 = vmax.f32 %v1846_v25, 0.0  ;;  %v1018_v6 = vmax.f32 %v1848_v29, 0.0  ;;  %v1019_v13 = vmax.f32 %v1850_v33, 0.0  ;;  %v1020_v14 = vmax.f32 %v1852_v37, 0.0 }
 0x1e1   : > { %1029 = vst [vmem:[#allocation10] sm:$0xff] %v1013_v8  ;;  %v1021_v15 = vmax.f32 %v1854_v41, 0.0  ;;  %v1022_v17 = vmax.f32 %v1856_v46, 0.0  ;;  %v1023_v18 = vmax.f32 %v1858_v50, 0.0  ;;  %v1024_v19 = vmax.f32 %v1860_v54, 0.0 }
 0x1e2   : > { %1030 = vst [vmem:[#allocation10 + $0x8] sm:$0xff] %v1014_v9  ;;  %v1025_v22 = vmax.f32 %v1000_v58, 0.0  ;;  %v1026_v23 = vmax.f32 %v1002_v62, 0.0  ;;  %v1027_v24 = vmax.f32 %v1005_v2, 0.0  ;;  %v1028_v26 = vmax.f32 %v1007_v7, 0.0 }
 0x1e3   : > { %1031 = vst [vmem:[#allocation10 + $0x10] sm:$0xff] %v1015_v10 }
 0x1e4   : > { %1032 = vst [vmem:[#allocation10 + $0x18] sm:$0xff] %v1016_v20 }
 0x1e5   : > { %1033 = vst [vmem:[#allocation10 + $0x20] sm:$0xff] %v1017_v11 }
 0x1e6   : > { %1034 = vst [vmem:[#allocation10 + $0x28] sm:$0xff] %v1018_v6 }
 0x1e7   : > { %1035 = vst [vmem:[#allocation10 + $0x30] sm:$0xff] %v1019_v13 }
 0x1e8   : > { %1036 = vst [vmem:[#allocation10 + $0x38] sm:$0xff] %v1020_v14 }
 0x1e9   : > { %1037 = vst [vmem:[#allocation10 + $0x40] sm:$0xff] %v1021_v15 }
 0x1ea   : > { %1038 = vst [vmem:[#allocation10 + $0x48] sm:$0xff] %v1022_v17 }
 0x1eb   : > { %1039 = vst [vmem:[#allocation10 + $0x50] sm:$0xff] %v1023_v18 }
 0x1ec   : > { %1040 = vst [vmem:[#allocation10 + $0x58] sm:$0xff] %v1024_v19 }
 0x1ed   : > { %1041 = vst [vmem:[#allocation10 + $0x60] sm:$0xff] %v1025_v22 }
 0x1ee   : > { %1042 = vst [vmem:[#allocation10 + $0x68] sm:$0xff] %v1026_v23 }
 0x1ef   : > { %1043 = vst [vmem:[#allocation10 + $0x70] sm:$0xff] %v1027_v24 }
 0x1f0   : > { %1044 = vst [vmem:[#allocation10 + $0x78] sm:$0xff] %v1028_v26 }
 0x1f1 PF: > { %p1352_p9 = scmp.ne.s32.totalorder %s1651_s10, 2 }
 0x1f3   : > { %1048 = sbr.rel (%p1352_p9) target bundleno = 520 (0x208), region = 87 }
 0x1f8   : > { %1049 = vst [vmem:[#allocation10] sm:$0xff] %v1838_v44 }
 0x1f9   : > { %1050 = vst [vmem:[#allocation10 + $0x8] sm:$0xff] %v1840_v12 }
 0x1fa   : > { %1051 = vst [vmem:[#allocation10 + $0x10] sm:$0xff] %v1842_v16 }
 0x1fb   : > { %1052 = vst [vmem:[#allocation10 + $0x18] sm:$0xff] %v1844_v21 }
 0x1fc   : > { %1053 = vst [vmem:[#allocation10 + $0x20] sm:$0xff] %v1846_v25 }
 0x1fd   : > { %1054 = vst [vmem:[#allocation10 + $0x28] sm:$0xff] %v1848_v29 }
 0x1fe   : > { %1055 = vst [vmem:[#allocation10 + $0x30] sm:$0xff] %v1850_v33 }
 0x1ff   : > { %1056 = vst [vmem:[#allocation10 + $0x38] sm:$0xff] %v1852_v37 }
 0x200   : > { %1057 = vst [vmem:[#allocation10 + $0x40] sm:$0xff] %v1854_v41 }
 0x201   : > { %1058 = vst [vmem:[#allocation10 + $0x48] sm:$0xff] %v1856_v46 }
 0x202   : > { %1059 = vst [vmem:[#allocation10 + $0x50] sm:$0xff] %v1858_v50 }
 0x203   : > { %1060 = vst [vmem:[#allocation10 + $0x58] sm:$0xff] %v1860_v54 }
 0x204   : > { %1061 = vst [vmem:[#allocation10 + $0x60] sm:$0xff] %v1000_v58 }
 0x205   : > { %1062 = vst [vmem:[#allocation10 + $0x68] sm:$0xff] %v1002_v62 }
 0x206   : > { %1063 = vst [vmem:[#allocation10 + $0x70] sm:$0xff] %v1005_v2 }
 0x207   : > { %1064 = vst [vmem:[#allocation10 + $0x78] sm:$0xff] %v1007_v7 }
 0x208 PF: > { %s1072_s22 = sshll.u32 %s1913_s9, 4  ;;  %s1593_s23 = smov 128   ;;  %s1073_s22 = int_to_ptr.hbm [resolvable:$true] %s1072_s22 }
 0x209   : > { %s1594_s24 = smov 8  }
 0x20a   : > { %1409 = dma.vmem_to_hbm [thread:$0]  (%p1351_p8), %s417_s29, 2048, %s1073_s22, [#allocation5], %s1593_s23, %s1593_s23, %s1594_s24  }
 0x20b   : > { %1577 = dma.done.wait (%p1351_p8), [#allocation5], 2048  }
 0x20c   : > { %1579 = vsyncadd (%p1351_p8), [#allocation5], 4294965248 }
 0x20d PF: > { %s22_s30 = sadd.s32 1, %s1582_s30  }
 0x20e   : > { %p19_p10 = scmp.ge.s32.totalorder %s22_s30, 5  }
 0x210   :  { %21 = sbr.rel (!%p19_p10) target bundleno = 3 (0x3), region = 141 }
 0x215   :  { %1089 = vsyncpa [#allocation5], 1 }
 0x216   :  { %1091 = vsyncpa [#allocation5 + $0x1], 1 }
 0x217   :  { %1092 = vsyncpa [#allocation6], 1 }
 0x218   :  { %1094 = vsyncpa [#allocation6 + $0x1], 1 }
 0x219   :  { %1095 = vsyncpa [#allocation8], 1 }
 0x21a   :  { %1096 = vsyncmov [#allocation3] }
 0x21d   :  { %s1097_s25 = vpop.sfrf %1096 }
 0x21e   :  { %p1357_p11 = scmp.ne.s32.totalorder %s1097_s25, 0 }
 0x220   :  { %1101 = shalt.err (%p1357_p11)  }

</bundles_post_ra>
